<compile_context>
chip_gen: v7x
topology: tpu7x:2x2x1
jax: 0.10.0
libtpu: 0.0.40
codegen_flags: <defaults>
</compile_context>

<pallas_src>
import functools

import jax
import jax.numpy as jnp
from jax import lax
from jax.experimental import pallas as pl
from jax.experimental.pallas import tpu as pltpu


# ----------------------------------------------------------------------------
# Kernels
# ----------------------------------------------------------------------------
def _fc_kernel_multi_k(x_ref, wt_ref, b_ref, o_ref, acc_ref, *, precision):
    # x_ref : (tm, tk)  input dtype (cast to MXU dtype in-register)
    # wt_ref: (tk, tn)  compute dtype (W^T)
    # b_ref : (1,  tn)  f32
    # o_ref : (tm, tn)  output dtype
    # acc_ref: (tm, tn) f32 scratch, persists across the K grid axis
    k = pl.program_id(2)

    @pl.when(k == 0)
    def _():
        acc_ref[...] = jnp.zeros_like(acc_ref)

    x_blk = x_ref[...].astype(wt_ref.dtype)
    acc_ref[...] += jnp.dot(
        x_blk, wt_ref[...],
        preferred_element_type=jnp.float32,
        precision=precision,
    )

    @pl.when(k == pl.num_programs(2) - 1)
    def _():
        o_ref[...] = (acc_ref[...] + b_ref[...]).astype(o_ref.dtype)


def _fc_kernel_single_k(x_ref, wt_ref, b_ref, o_ref, *, precision):
    # Fast path: whole K reduction in one step -> no accumulator scratch,
    # no zero-init, no read-modify-write.
    x_blk = x_ref[...].astype(wt_ref.dtype)
    acc = jnp.dot(
        x_blk, wt_ref[...],
        preferred_element_type=jnp.float32,
        precision=precision,
    )
    o_ref[...] = (acc + b_ref[...]).astype(o_ref.dtype)


# ----------------------------------------------------------------------------
# Wrapper
# ----------------------------------------------------------------------------
def _round_up(a, b):
    return (a + b - 1) // b * b


_VMEM_LIMIT_FLOOR = 32 << 20   # covers v5e's 16 MiB scoped default
_VMEM_LIMIT_CAP = 48 << 20     # stays safely under v7x's 64 MiB physical VMEM


@functools.partial(
    jax.jit, static_argnames=("tile_m", "tile_n", "tile_k", "compute_dtype")
)
def fc_forward(
    x,
    wt,
    bias,
    *,
    tile_m=None,
    tile_n=None,
    tile_k=None,
    compute_dtype=jnp.bfloat16,
):
    """y = x @ wt + bias  (wt is the pre-transposed Linear weight, shape (K, N))."""
    M, K = x.shape
    K2, N = wt.shape
    assert K == K2, "weight/in-feature mismatch"
    out_dtype = x.dtype
    comp = jnp.dtype(compute_dtype)

    # --- tile selection -----------------------------------------------------
    sublane = 16 if comp.itemsize == 2 else 8      # bf16 packs 16 rows/vreg
    if tile_m is None:
        tile_m = min(512, _round_up(M, sublane))
    if tile_n is None:
        tile_n = min(1024, _round_up(N, 128))
    if tile_k is None:
        tile_k = min(1024, _round_up(K, 128))

    Mp = _round_up(M, tile_m)
    Np = _round_up(N, tile_n)
    Kp = _round_up(K, tile_k)

    # v7x megacore: if both parallel axes collapsed to one block, split N so
    # both TensorCores get work (legal only when Np/2 stays 128-aligned).
    if Mp // tile_m == 1 and Np // tile_n == 1 and Np >= 256 and Np % 256 == 0:
        tile_n = Np // 2

    grid_m = Mp // tile_m
    grid_n = Np // tile_n
    grid_k = Kp // tile_k
    single_k = grid_k == 1

    # --- input preparation ----------------------------------------------------
    # Only materialize a casted copy of x when the N-grid re-reads it; otherwise
    # stream it once in its native dtype and cast in-register inside the kernel.
    precast_x = (grid_n > 1) and (x.dtype != comp)
    x_in = x.astype(comp) if precast_x else x
    if (Mp, Kp) != (M, K):
        x_in = jnp.pad(x_in, ((0, Mp - M), (0, Kp - K)))

    # Weight should already be in the compute dtype (done once at init); this
    # cast is a no-op in that case.  Padding only happens for ragged shapes.
    wt_in = wt if wt.dtype == comp else wt.astype(comp)
    if (Kp, Np) != (K, N):
        wt_in = jnp.pad(wt_in, ((0, Kp - K), (0, Np - N)))

    b_row = bias.astype(jnp.float32).reshape(1, N)
    if Np != N:
        b_row = jnp.pad(b_row, ((0, 0), (0, Np - N)))

    precision = (
        lax.Precision.HIGHEST
        if comp == jnp.dtype(jnp.float32)
        else lax.Precision.DEFAULT
    )

    # --- VMEM budget / limit --------------------------------------------------
    x_bytes = jnp.dtype(x_in.dtype).itemsize
    w_bytes = comp.itemsize
    o_bytes = jnp.dtype(out_dtype).itemsize
    footprint = (
        2 * tile_m * tile_k * x_bytes          # x, double-buffered
        + 2 * tile_k * tile_n * w_bytes        # W^T, double-buffered
        + 2 * tile_n * 4                       # bias
        + 2 * tile_m * tile_n * o_bytes        # output
        + (0 if single_k else tile_m * tile_n * 4)  # f32 accumulator
    )
    vmem_limit = int(min(max(2 * footprint, _VMEM_LIMIT_FLOOR), _VMEM_LIMIT_CAP))

    cost = pl.CostEstimate(
        flops=2 * Mp * Np * Kp,
        transcendentals=0,
        bytes_accessed=(Mp * Kp * x_bytes + Kp * Np * w_bytes
                        + Mp * Np * o_bytes + Np * 4),
    )

    # --- pallas_call ----------------------------------------------------------
    if single_k:
        kernel = functools.partial(_fc_kernel_single_k, precision=precision)
        out = pl.pallas_call(
            kernel,
            out_shape=jax.ShapeDtypeStruct((Mp, Np), out_dtype),
            grid_spec=pltpu.PrefetchScalarGridSpec(
                num_scalar_prefetch=0,
                grid=(grid_m, grid_n),
                in_specs=[
                    pl.BlockSpec((tile_m, tile_k), lambda i, j: (i, 0)),  # x
                    pl.BlockSpec((tile_k, tile_n), lambda i, j: (0, j)),  # W^T
                    pl.BlockSpec((1, tile_n), lambda i, j: (0, j)),       # bias
                ],
                out_specs=pl.BlockSpec((tile_m, tile_n), lambda i, j: (i, j)),
            ),
            compiler_params=pltpu.CompilerParams(
                dimension_semantics=("parallel", "parallel"),
                vmem_limit_bytes=vmem_limit,
            ),
            cost_estimate=cost,
        )(x_in, wt_in, b_row)
    else:
        kernel = functools.partial(_fc_kernel_multi_k, precision=precision)
        out = pl.pallas_call(
            kernel,
            out_shape=jax.ShapeDtypeStruct((Mp, Np), out_dtype),
            grid_spec=pltpu.PrefetchScalarGridSpec(
                num_scalar_prefetch=0,
                grid=(grid_m, grid_n, grid_k),
                in_specs=[
                    pl.BlockSpec((tile_m, tile_k), lambda i, j, k: (i, k)),  # x
                    pl.BlockSpec((tile_k, tile_n), lambda i, j, k: (k, j)),  # W^T
                    pl.BlockSpec((1, tile_n), lambda i, j, k: (0, j)),       # bias
                ],
                out_specs=pl.BlockSpec((tile_m, tile_n), lambda i, j, k: (i, j)),
                scratch_shapes=[pltpu.VMEM((tile_m, tile_n), jnp.float32)],
            ),
            compiler_params=pltpu.CompilerParams(
                dimension_semantics=("parallel", "parallel", "arbitrary"),
                vmem_limit_bytes=vmem_limit,
            ),
            cost_estimate=cost,
        )(x_in, wt_in, b_row)

    if (Mp, Np) != (M, N):
        out = out[:M, :N]
    return out


# ----------------------------------------------------------------------------
# Param init (matches torch.nn.Linear default init)
# ----------------------------------------------------------------------------
def init_fc_params(key, nn_in, nn_out, dtype=jnp.float32,
                   compute_dtype=jnp.bfloat16):
    """U(-1/sqrt(nn_in), 1/sqrt(nn_in)) init.

    Returns the weight already transposed to (nn_in, nn_out) AND pre-cast to the
    compute dtype (one-time layout/dtype change at init, nothing per call),
    plus the f32 bias and the original f32 weight for reference checks."""
    kw, kb = jax.random.split(key)
    bound = 1.0 / (nn_in ** 0.5)
    weight = jax.random.uniform(kw, (nn_out, nn_in), dtype, -bound, bound)
    bias = jax.random.uniform(kb, (nn_out,), dtype, -bound, bound)
    wt = weight.T.astype(compute_dtype)
    return wt, bias, weight


# ----------------------------------------------------------------------------
# Self-test
# ----------------------------------------------------------------------------
if __name__ == "__main__":
    key = jax.random.PRNGKey(0)

    # ---- case 1: toy module shapes, f32 compute path (tight tolerance) -----
    k_x, k_p = jax.random.split(key)
    batch, nn_in, nn_out = 8, 32, 16
    x = jax.random.normal(k_x, (batch, nn_in), jnp.float32)
    wt_f32, bias, weight = init_fc_params(k_p, nn_in, nn_out,
                                          compute_dtype=jnp.float32)
    y_ref = x @ weight.T + bias

    y_f32 = jax.block_until_ready(
        fc_forward(x, wt_f32, bias, compute_dtype=jnp.float32)
    )
    assert y_f32.shape == (batch, nn_out)
    assert jnp.allclose(y_f32, y_ref, atol=1e-5, rtol=1e-5), "f32 mismatch"

    # ---- case 2: same shapes, bf16 MXU path (weight pre-cast at init) ------
    wt_bf16 = wt_f32.astype(jnp.bfloat16)
    y_bf16 = jax.block_until_ready(
        fc_forward(x, wt_bf16, bias, compute_dtype=jnp.bfloat16)
    )
    assert jnp.allclose(y_bf16, y_ref, atol=5e-2, rtol=5e-2), "bf16 mismatch"

    # ---- case 3: ragged, non-aligned shapes (padding path), f32 ------------
    k_x2, k_p2 = jax.random.split(jax.random.PRNGKey(1))
    b2, in2, out2 = 50, 200, 130
    x2 = jax.random.normal(k_x2, (b2, in2), jnp.float32)
    wt2, bias2, weight2 = init_fc_params(k_p2, in2, out2,
                                         compute_dtype=jnp.float32)
    y2 = jax.block_until_ready(
        fc_forward(x2, wt2, bias2, compute_dtype=jnp.float32)
    )
    y2_ref = x2 @ weight2.T + bias2
    assert y2.shape == (b2, out2)
    assert jnp.allclose(y2, y2_ref, atol=1e-4, rtol=1e-4), "ragged mismatch"

    # ---- case 4: explicit small tiles -> multi-K accumulator path, bf16 ----
    k_x3, k_p3 = jax.random.split(jax.random.PRNGKey(2))
    b3, in3, out3 = 32, 300, 200
    x3 = jax.random.normal(k_x3, (b3, in3), jnp.float32)
    wt3, bias3, weight3 = init_fc_params(k_p3, in3, out3,
                                         compute_dtype=jnp.bfloat16)
    y3 = jax.block_until_ready(
        fc_forward(x3, wt3, bias3, tile_m=16, tile_n=128, tile_k=128,
                   compute_dtype=jnp.bfloat16)
    )
    y3_ref = x3 @ weight3.T + bias3
    assert y3.shape == (b3, out3)
    assert jnp.allclose(y3, y3_ref, atol=5e-2, rtol=5e-2), "multi-K mismatch"

    print("KERNEL_OK")
</pallas_src>

<mosaic_0001>
module attributes {stable_mosaic.version = 11 : i64} {
  func.func @_fc_kernel_single_k(%arg0: i32, %arg1: i32, %arg2: memref<8x128xf32, #tpu.memory_space<vmem>>, %arg3: memref<128x128xf32, #tpu.memory_space<vmem>>, %arg4: memref<1x128xf32, #tpu.memory_space<vmem>>, %arg5: memref<8x128xf32, #tpu.memory_space<vmem>>) attributes {dimension_semantics = [#tpu.dimension_semantics<parallel>, #tpu.dimension_semantics<parallel>], iteration_bounds = array<i64: 1, 1>, scalar_prefetch = 0 : i64, scratch_operands = 0 : i64, tpu.core_type = #tpu.core_type<tc>, window_params = [{transform_indices = @transform_0, window_bounds = array<i64: 8, 128>}, {transform_indices = @transform_1, window_bounds = array<i64: 128, 128>}, {transform_indices = @transform_2, window_bounds = array<i64: 1, 128>}, {transform_indices = @transform_3, window_bounds = array<i64: 8, 128>}]} {
    %c0 = arith.constant 0 : index
    %c0_0 = arith.constant 0 : index
    %0 = vector.load %arg2[%c0, %c0_0] : memref<8x128xf32, #tpu.memory_space<vmem>>, vector<8x128xf32>
    %c0_1 = arith.constant 0 : index
    %c0_2 = arith.constant 0 : index
    %1 = vector.load %arg3[%c0_1, %c0_2] : memref<128x128xf32, #tpu.memory_space<vmem>>, vector<128x128xf32>
    %cst = arith.constant dense<0.000000e+00> : vector<8x128xf32>
    %2 = tpu.matmul %0, %1, %cst {dimension_numbers = #tpu.dot_dimension_numbers<[1], [0], [0], [1], [0, 0, 1, 1], [], []>, precision = #tpu.contract_precision<fp32>} : vector<8x128xf32>, vector<128x128xf32>, vector<8x128xf32> -> vector<8x128xf32>
    %c0_3 = arith.constant 0 : index
    %c0_4 = arith.constant 0 : index
    %3 = vector.load %arg4[%c0_3, %c0_4] : memref<1x128xf32, #tpu.memory_space<vmem>>, vector<1x128xf32>
    %4 = vector.broadcast %3 : vector<1x128xf32> to vector<8x128xf32>
    %5 = arith.addf %2, %4 : vector<8x128xf32>
    %c0_5 = arith.constant 0 : index
    %c0_6 = arith.constant 0 : index
    %6 = vector.load %arg5[%c0_5, %c0_6] : memref<8x128xf32, #tpu.memory_space<vmem>>, vector<8x128xf32>
    tpu.vector_store %arg5[%c0_5, %c0_6], %5 {strides = array<i32>} : memref<8x128xf32, #tpu.memory_space<vmem>>, vector<8x128xf32>,
    return
  }
  func.func @transform_0(%arg0: i32, %arg1: i32) -> (i32, i32) {
    %c0_i32 = arith.constant 0 : i32
    %c0_i32_0 = arith.constant 0 : i32
    return %arg0, %c0_i32 : i32, i32
  }
  func.func @transform_1(%arg0: i32, %arg1: i32) -> (i32, i32) {
    %c0_i32 = arith.constant 0 : i32
    %c0_i32_0 = arith.constant 0 : i32
    return %c0_i32, %arg1 : i32, i32
  }
  func.func @transform_2(%arg0: i32, %arg1: i32) -> (i32, i32) {
    %c0_i32 = arith.constant 0 : i32
    %c0_i32_0 = arith.constant 0 : i32
    return %c0_i32, %arg1 : i32, i32
  }
  func.func @transform_3(%arg0: i32, %arg1: i32) -> (i32, i32) {
    %c0_i32 = arith.constant 0 : i32
    return %arg0, %arg1 : i32, i32
  }
}

</mosaic_0001>

<bundles_post_ra>
// kernel: fc_forward.1
= control target key start
LH: loop header
LB: loop body
LE: loop exit
PB: predicated region body
PF: predicated region fallthrough
CT: control target
= control target key end

     0   :  { %v1190_v3 = vmov 0.0|0.0   ;;  %vm1191_vm0 = vmmov 0   ;;  %v1192_v11 = vmov 0.0   ;;  %s1527_s0 = inlined_call_operand.vmem [shape: f32[8,128], index: 0, kind: input, shape index: {}]   ;;  %s1528_s1 = inlined_call_operand.vmem [shape: f32[128,128], index: 1, kind: input, shape index: {}]   ;;  %s1529_s2 = inlined_call_operand.vmem [shape: f32[1,128], index: 2, kind: input, shape index: {}]   ;;  %s1530_s3 = inlined_call_operand.hbm [shape: f32[8,128], index: 3, kind: output, shape index: {}]  }
   0x1   :  { %v16_v0 = vld [vmem:[%s1528_s1] sm:$0xff]  ;;  %v17_v1 = vld [vmem:[%s1528_s1 + $0x8] sm:$0xff]  ;;  %v18_v2 = vld [vmem:[%s1528_s1 + $0x10] sm:$0xff]  ;;  %1008 = vmatprep.subr.bf16.mxu1 %v1190_v3  ;;  %1080 = vmatprep.subr.bf16.mxu0 %v1190_v3 }
   0x2   :  { %v40_v4 = vand.u32 4294901760, %v16_v0  ;;  %v43_v5 = vand.u32 4294901760, %v17_v1  ;;  %v19_v6 = vld [vmem:[%s1528_s1 + $0x18] sm:$0xff]  ;;  %v46_v7 = vand.u32 4294901760, %v18_v2  ;;  %v20_v9 = vld [vmem:[%s1528_s1 + $0x20] sm:$0xff]  ;;  %v21_v10 = vld [vmem:[%s1528_s1 + $0x28] sm:$0xff]  ;;  %830 = vmatprep.mubr.msk.f32.mxu1 %vm1191_vm0, %v1192_v11  ;;  %935 = vmatprep.mubr.msk.f32.mxu0 %vm1191_vm0, %v1192_v11 }
   0x3   :  { %v49_v8 = vand.u32 4294901760, %v19_v6  ;;  %v52_v14 = vand.u32 4294901760, %v20_v9  ;;  %v55_v15 = vand.u32 4294901760, %v21_v10  ;;  %v22_v16 = vld [vmem:[%s1528_s1 + $0x30] sm:$0xff]  ;;  %v23_v17 = vld [vmem:[%s1528_s1 + $0x38] sm:$0xff] }
   0x4   :  { %v1238_v12 = vpack.c.bf16 %v43_v5, %v40_v4 }
   0x5   :  { %v1242_v13 = vpack.c.bf16 %v49_v8, %v46_v7 }
   0x6   :  { %1010 = vmatpush3.bf16.msra.mxu1 %v1238_v12  ;;  %1082 = vmatpush3.bf16.msra.mxu0 %v1238_v12 }
   0x7   :  { %1011 = vmatprep.subr.bf16.mxu1 %v1190_v3  ;;  %1083 = vmatprep.subr.bf16.mxu0 %v1190_v3 }
   0x8   :  { %8 = vsyncpa [#allocation3], 0  ;;  %v1254_v18 = vpack.c.bf16 %v55_v15, %v52_v14  ;;  %v58_v19 = vand.u32 4294901760, %v22_v16  ;;  %v61_v20 = vand.u32 4294901760, %v23_v17  ;;  %v1261_v21 = vld [vmem:[%s1528_s1 + $0x40] sm:$0xff]  ;;  %v1266_v22 = vld [vmem:[%s1528_s1 + $0x48] sm:$0xff]  ;;  %v1289_v29 = vsub.f32 %v16_v0, %v40_v4 }
   0x9   :  { %v64_v24 = vand.u32 4294901760, %v1261_v21  ;;  %v67_v25 = vand.u32 4294901760, %v1266_v22  ;;  %v15_v26 = vld [vmem:[%s1527_s0] sm:$0xff]  ;;  %v1282_v27 = vld [vmem:[%s1528_s1 + $0x50] sm:$0xff]  ;;  %v1287_v28 = vld [vmem:[%s1528_s1 + $0x58] sm:$0xff]  ;;  %v1293_v31 = vsub.f32 %v17_v1, %v43_v5  ;;  %v1313_v37 = vsub.f32 %v18_v2, %v46_v7  ;;  %s1193_s19 = smov [#allocation2]  }
   0xa   :  { %1013 = vmatpush3.bf16.msra.mxu1 %v1242_v13  ;;  %1085 = vmatpush3.bf16.msra.mxu0 %v1242_v13  ;;  %v1270_v23 = vpack.c.bf16 %v61_v20, %v58_v19  ;;  %v1291_v30 = vand.u32 4294901760, %v15_v26  ;;  %v70_v33 = vand.u32 4294901760, %v1282_v27  ;;  %v73_v34 = vand.u32 4294901760, %v1287_v28  ;;  %v1304_v35 = vld [vmem:[%s1528_s1 + $0x60] sm:$0xff]  ;;  %v1311_v36 = vld [vmem:[%s1528_s1 + $0x68] sm:$0xff]  ;;  %v1333_v43 = vld [vmem:[%s1528_s1 + $0x70] sm:$0xff] }
   0xb   :  { %1014 = vmatprep.subr.bf16.mxu1 %v1190_v3  ;;  %1086 = vmatprep.subr.bf16.mxu0 %v1190_v3  ;;  %v1297_v32 = vpack.c.bf16 %v67_v25, %v64_v24  ;;  %v1315_v38 = vsub.f32 %v19_v6, %v49_v8  ;;  %v76_v39 = vand.u32 4294901760, %v1304_v35  ;;  %v79_v42 = vand.u32 4294901760, %v1311_v36  ;;  %v1338_v44 = vld [vmem:[%s1528_s1 + $0x78] sm:$0xff]  ;;  %s687_s20 = sshll.u32 %s1193_s19, 4  ;;  %s688_s20 = int_to_ptr.vmem [resolvable:$true] %s687_s20 }
   0xc   :  { %v1319_v40 = vsub.f32 %v15_v26, %v1291_v30  ;;  %v1327_v41 = vpack.c.bf16 %v73_v34, %v70_v33  ;;  %v133_v45 = vand.u32 4294901760, %v1289_v29  ;;  %v140_v46 = vand.u32 4294901760, %v1293_v31  ;;  %s1166_s21 = scalar_lea.vmem %s688_s20, 128  ;;  %p1171_p1 = scmp.lt.s32.totalorder %s688_s20, %s688_s20 }
   0xd   :  { %v1344_v47 = vsub.f32 %v20_v9, %v52_v14  ;;  %v1346_v48 = vsub.f32 %v21_v10, %v55_v15  ;;  %v82_v49 = vand.u32 4294901760, %v1333_v43  ;;  %v85_v50 = vand.u32 4294901760, %v1338_v44  ;;  %p1167_p0 = scmp.ne.s32.totalorder %s688_s20, %s1166_s21  ;;  %p1172_p2 = scmp.lt.s32.totalorder %s1166_s21, %s1166_s21 }
   0xe   :  { %1016 = vmatpush3.bf16.msra.mxu1 %v1254_v18  ;;  %1088 = vmatpush3.bf16.msra.mxu0 %v1254_v18  ;;  %v122_v51 = vand.u32 4294901760, %v1319_v40  ;;  %v147_v52 = vand.u32 4294901760, %v1313_v37  ;;  %v1358_v53 = vpack.c.bf16 %v79_v42, %v76_v39  ;;  %v134_v54 = vsub.f32 %v1289_v29, %v133_v45 }
   0xf   :  { %1017 = vmatprep.subr.bf16.mxu1 %v1190_v3  ;;  %1089 = vmatprep.subr.bf16.mxu0 %v1190_v3  ;;  %v141_v55 = vsub.f32 %v1293_v31, %v140_v46  ;;  %v154_v56 = vand.u32 4294901760, %v1315_v38  ;;  %v1365_v57 = vsub.f32 %v22_v16, %v58_v19  ;;  %v1367_v58 = vsub.f32 %v23_v17, %v61_v20  ;;  %p1173_p3 = por %p1172_p2, %p1171_p1 }
  0x10   :  { %v123_v59 = vsub.f32 %v1319_v40, %v122_v51  ;;  %v148_v60 = vsub.f32 %v1313_v37, %v147_v52  ;;  %v161_v61 = vand.u32 4294901760, %v1344_v47  ;;  %v168_v62 = vand.u32 4294901760, %v1346_v48 }
  0x11   :  { %v1379_v63 = vpack.c.bf16 %v85_v50, %v82_v49  ;;  %v135_v0 = vand.u32 4294901760, %v134_v54  ;;  %v142_v1 = vand.u32 4294901760, %v141_v55  ;;  %v155_v2 = vsub.f32 %v1315_v38, %v154_v56  ;;  %p1174_p4 = pnand %p1173_p3, %p1167_p0 }
  0x12   :  { %1019 = vmatpush3.bf16.msra.mxu1 %v1270_v23  ;;  %1091 = vmatpush3.bf16.msra.mxu0 %v1270_v23  ;;  %v1385_v4 = vsub.f32 %v1261_v21, %v64_v24  ;;  %v1388_v5 = vsub.f32 %v1266_v22, %v67_v25  ;;  %v1105_v6 = vpack.c.bf16 %v140_v46, %v133_v45  ;;  %v124_v7 = vand.u32 4294901760, %v123_v59 }
  0x13   :  { %1020 = vmatprep.subr.bf16.mxu1 %v1190_v3  ;;  %1092 = vmatprep.subr.bf16.mxu0 %v1190_v3  ;;  %v149_v8 = vand.u32 4294901760, %v148_v60  ;;  %v162_v9 = vsub.f32 %v1344_v47, %v161_v61  ;;  %v169_v10 = vsub.f32 %v1346_v48, %v168_v62  ;;  %v1033_v14 = vpack.c.bf16 %v142_v1, %v135_v0 }
  0x14   :  { %v156_v15 = vand.u32 4294901760, %v155_v2  ;;  %v175_v16 = vand.u32 4294901760, %v1365_v57  ;;  %v182_v17 = vand.u32 4294901760, %v1367_v58  ;;  %v1401_v19 = vsub.f32 %v1282_v27, %v70_v33 }
  0x15   :  { %v1406_v20 = vsub.f32 %v1287_v28, %v73_v34  ;;  %v1108_v21 = vpack.c.bf16 %v154_v56, %v147_v52  ;;  %v163_v22 = vand.u32 4294901760, %v162_v9  ;;  %v170_v24 = vand.u32 4294901760, %v169_v10 }
  0x16   :  { %1022 = vmatpush3.bf16.msra.mxu1 %v1297_v32  ;;  %1094 = vmatpush3.bf16.msra.mxu0 %v1297_v32  ;;  %v189_v25 = vand.u32 4294901760, %v1385_v4  ;;  %v1036_v26 = vpack.c.bf16 %v156_v15, %v149_v8  ;;  %v176_v45 = vsub.f32 %v1365_v57, %v175_v16  ;;  %v183_v27 = vsub.f32 %v1367_v58, %v182_v17 }
  0x17   :  { %1023 = vmatprep.subr.bf16.mxu1 %v1190_v3  ;;  %1095 = vmatprep.subr.bf16.mxu0 %v1190_v3  ;;  %v196_v33 = vand.u32 4294901760, %v1388_v5  ;;  %v1417_v28 = vsub.f32 %v1304_v35, %v76_v39  ;;  %v1422_v34 = vsub.f32 %v1311_v36, %v79_v42  ;;  %v1039_v46 = vpack.c.bf16 %v170_v24, %v163_v22 }
  0x18   :  { %v190_v52 = vsub.f32 %v1385_v4, %v189_v25  ;;  %v203_v54 = vand.u32 4294901760, %v1401_v19  ;;  %v177_v35 = vand.u32 4294901760, %v176_v45  ;;  %v184_v39 = vand.u32 4294901760, %v183_v27 }
  0x19   :  { %v197_v55 = vsub.f32 %v1388_v5, %v196_v33  ;;  %v210_v36 = vand.u32 4294901760, %v1406_v20  ;;  %v1437_v42 = vsub.f32 %v1333_v43, %v82_v49  ;;  %v1442_v56 = vsub.f32 %v1338_v44, %v85_v50 }
  0x1a   :  { %1025 = vmatpush3.bf16.msra.mxu1 %v1327_v41  ;;  %1097 = vmatpush3.bf16.msra.mxu0 %v1327_v41  ;;  %v1114_v59 = vpack.c.bf16 %v182_v17, %v175_v16  ;;  %v191_v60 = vand.u32 4294901760, %v190_v52  ;;  %v1042_v0 = vpack.c.bf16 %v184_v39, %v177_v35  ;;  %v224_v43 = vand.u32 4294901760, %v1422_v34 }
  0x1b   :  { %1026 = vmatprep.subr.bf16.mxu1 %v1190_v3  ;;  %1098 = vmatprep.subr.bf16.mxu0 %v1190_v3  ;;  %v198_v1 = vand.u32 4294901760, %v197_v55  ;;  %v211_v2 = vsub.f32 %v1406_v20, %v210_v36  ;;  %v1117_v44 = vpack.c.bf16 %v196_v33, %v189_v25  ;;  %v238_v10 = vand.u32 4294901760, %v1442_v56 }
  0x1c   :  { %v225_v9 = vsub.f32 %v1422_v34, %v224_v43 }
  0x1d   :  { %v212_v8 = vand.u32 4294901760, %v211_v2  ;;  %v239_v22 = vsub.f32 %v1442_v56, %v238_v10 }
  0x1e   :  { %1028 = vmatpush3.bf16.msra.mxu1 %v1358_v53  ;;  %1100 = vmatpush3.bf16.msra.mxu0 %v1358_v53  ;;  %v226_v17 = vand.u32 4294901760, %v225_v9 }
  0x1f   :  { %1029 = vmatprep.subr.bf16.mxu1 %v1190_v3  ;;  %1101 = vmatprep.subr.bf16.mxu0 %v1190_v3  ;;  %v240_v45 = vand.u32 4294901760, %v239_v22 }
  0x22   :  { %1031 = vmatpush3.bf16.msra.mxu1 %v1379_v63  ;;  %1103 = vmatpush3.bf16.msra.mxu0 %v1379_v63 }
  0x23   :  { %1032 = vmatprep.subr.bf16.mxu1 %v1190_v3  ;;  %1104 = vmatprep.subr.bf16.mxu0 %v1190_v3 }
  0x25   :  { %831 = vmatmul.mubr.f32.vlgmr.msra.gmra.mrb[0].mxu1 %v124_v7  ;;  %936 = vmatmul.mubr.f32.vlgmr.msra.gmra.mrb[0].mxu0 %v122_v51  ;;  %v1111_v51 = vpack.c.bf16 %v168_v62, %v161_v61  ;;  %v204_v61 = vsub.f32 %v1401_v19, %v203_v54  ;;  %v217_v62 = vand.u32 4294901760, %v1417_v28  ;;  %v1045_v7 = vpack.c.bf16 %v198_v1, %v191_v60 }
  0x26   :  { %1034 = vmatpush3.bf16.msra.mxu1 %v1033_v14  ;;  %1106 = vmatpush3.bf16.msra.mxu0 %v1105_v6  ;;  %v231_v6 = vand.u32 4294901760, %v1437_v42  ;;  %v1120_v14 = vpack.c.bf16 %v210_v36, %v203_v54 }
  0x27   :  { %1035 = vmatprep.subr.bf16.mxu1 %v1190_v3  ;;  %1107 = vmatprep.subr.bf16.mxu0 %v1190_v3  ;;  %v205_v49 = vand.u32 4294901760, %v204_v61  ;;  %v218_v50 = vsub.f32 %v1417_v28, %v217_v62  ;;  %v1123_v25 = vpack.c.bf16 %v224_v43, %v217_v62 }
  0x28   :  { %865 = vmatprep.mubr.msk.f32.mxu1 %vm1191_vm0, %v1192_v11  ;;  %970 = vmatprep.mubr.msk.f32.mxu0 %vm1191_vm0, %v1192_v11  ;;  %v1126_v33 = vpack.c.bf16 %v238_v10, %v231_v6 }
  0x29   :  { %v219_v15 = vand.u32 4294901760, %v218_v50  ;;  %v1048_v16 = vpack.c.bf16 %v212_v8, %v205_v49 }
  0x2a   :  { %1037 = vmatpush3.bf16.msra.mxu1 %v1036_v26  ;;  %1109 = vmatpush3.bf16.msra.mxu0 %v1108_v21  ;;  %v232_v21 = vsub.f32 %v1437_v42, %v231_v6 }
  0x2b   :  { %1038 = vmatprep.subr.bf16.mxu1 %v1190_v3  ;;  %1110 = vmatprep.subr.bf16.mxu0 %v1190_v3  ;;  %v1051_v24 = vpack.c.bf16 %v226_v17, %v219_v15 }
  0x2c   :  { %v233_v26 = vand.u32 4294901760, %v232_v21 }
  0x2e   :  { %1040 = vmatpush3.bf16.msra.mxu1 %v1039_v46  ;;  %1112 = vmatpush3.bf16.msra.mxu0 %v1111_v51  ;;  %v1054_v27 = vpack.c.bf16 %v240_v45, %v233_v26  ;;  %v1057_v46 = vpack.c.bf16 %v1293_v31, %v1289_v29  ;;  %v1060_v51 = vpack.c.bf16 %v1315_v38, %v1313_v37  ;;  %v695_v31 = vld [vmem:[%s1529_s2] ss:$0 sm:$0xff] }
  0x2f   :  { %1041 = vmatprep.subr.bf16.mxu1 %v1190_v3  ;;  %1113 = vmatprep.subr.bf16.mxu0 %v1190_v3  ;;  %v1063_v29 = vpack.c.bf16 %v1346_v48, %v1344_v47 }
  0x32   :  { %1043 = vmatpush3.bf16.msra.mxu1 %v1042_v0  ;;  %1115 = vmatpush3.bf16.msra.mxu0 %v1114_v59 }
  0x33   :  { %1044 = vmatprep.subr.bf16.mxu1 %v1190_v3  ;;  %1116 = vmatprep.subr.bf16.mxu0 %v1190_v3 }
  0x36   :  { %1046 = vmatpush3.bf16.msra.mxu1 %v1045_v7  ;;  %1118 = vmatpush3.bf16.msra.mxu0 %v1117_v44 }
  0x37   :  { %1047 = vmatprep.subr.bf16.mxu1 %v1190_v3  ;;  %1119 = vmatprep.subr.bf16.mxu0 %v1190_v3 }
  0x3a   :  { %1049 = vmatpush3.bf16.msra.mxu1 %v1048_v16  ;;  %1121 = vmatpush3.bf16.msra.mxu0 %v1120_v14 }
  0x3b   :  { %1050 = vmatprep.subr.bf16.mxu1 %v1190_v3  ;;  %1122 = vmatprep.subr.bf16.mxu0 %v1190_v3 }
  0x3e   :  { %1052 = vmatpush3.bf16.msra.mxu1 %v1051_v24  ;;  %1124 = vmatpush3.bf16.msra.mxu0 %v1123_v25 }
  0x3f   :  { %1053 = vmatprep.subr.bf16.mxu1 %v1190_v3  ;;  %1125 = vmatprep.subr.bf16.mxu0 %v1190_v3 }
  0x42   :  { %1055 = vmatpush3.bf16.msra.mxu1 %v1054_v27  ;;  %1127 = vmatpush3.bf16.msra.mxu0 %v1126_v33 }
  0x43   :  { %1056 = vmatprep.subr.bf16.mxu1 %v1190_v3  ;;  %1128 = vmatprep.subr.bf16.mxu0 %v1190_v3 }
  0x45   :  { %866 = vmatmul.mubr.f32.vlgmr.msra.gmra.mrb[0].mxu1 %v1291_v30  ;;  %971 = vmatmul.mubr.f32.vlgmr.msra.gmra.mrb[0].mxu0 %v1291_v30 }
  0x46   :  { %1058 = vmatpush3.bf16.msra.mxu1 %v1057_v46  ;;  %1130 = vmatpush3.bf16.msra.mxu0 %v1238_v12  ;;  %v1066_v12 = vpack.c.bf16 %v1367_v58, %v1365_v57 }
  0x47   :  { %1059 = vmatprep.subr.bf16.mxu1 %v1190_v3  ;;  %1131 = vmatprep.subr.bf16.mxu0 %v1190_v3 }
  0x48   :  { %900 = vmatprep.mubr.msk.f32.mxu1 %vm1191_vm0, %v1192_v11  ;;  %1005 = vmatprep.mubr.msk.f32.mxu0 %vm1191_vm0, %v1192_v11  ;;  %v1069_v11 = vpack.c.bf16 %v1388_v5, %v1385_v4 }
  0x4a   :  { %1061 = vmatpush3.bf16.msra.mxu1 %v1060_v51  ;;  %1133 = vmatpush3.bf16.msra.mxu0 %v1242_v13  ;;  %v1072_v13 = vpack.c.bf16 %v1406_v20, %v1401_v19 }
  0x4b   :  { %1062 = vmatprep.subr.bf16.mxu1 %v1190_v3  ;;  %1134 = vmatprep.subr.bf16.mxu0 %v1190_v3 }
  0x4e   :  { %1064 = vmatpush3.bf16.msra.mxu1 %v1063_v29  ;;  %1136 = vmatpush3.bf16.msra.mxu0 %v1254_v18  ;;  %v1075_v18 = vpack.c.bf16 %v1422_v34, %v1417_v28 }
  0x4f   :  { %1065 = vmatprep.subr.bf16.mxu1 %v1190_v3  ;;  %1137 = vmatprep.subr.bf16.mxu0 %v1190_v3 }
  0x52   :  { %1067 = vmatpush3.bf16.msra.mxu1 %v1066_v12  ;;  %1139 = vmatpush3.bf16.msra.mxu0 %v1270_v23  ;;  %v1078_v23 = vpack.c.bf16 %v1442_v56, %v1437_v42 }
  0x53   :  { %1068 = vmatprep.subr.bf16.mxu1 %v1190_v3  ;;  %1140 = vmatprep.subr.bf16.mxu0 %v1190_v3 }
  0x56   :  { %1070 = vmatpush3.bf16.msra.mxu1 %v1069_v11  ;;  %1142 = vmatpush3.bf16.msra.mxu0 %v1297_v32 }
  0x57   :  { %1071 = vmatprep.subr.bf16.mxu1 %v1190_v3  ;;  %1143 = vmatprep.subr.bf16.mxu0 %v1190_v3 }
  0x5a   :  { %1073 = vmatpush3.bf16.msra.mxu1 %v1072_v13  ;;  %1145 = vmatpush3.bf16.msra.mxu0 %v1327_v41 }
  0x5b   :  { %1074 = vmatprep.subr.bf16.mxu1 %v1190_v3  ;;  %1146 = vmatprep.subr.bf16.mxu0 %v1190_v3 }
  0x5e   :  { %1076 = vmatpush3.bf16.msra.mxu1 %v1075_v18  ;;  %1148 = vmatpush3.bf16.msra.mxu0 %v1358_v53 }
  0x5f   :  { %1077 = vmatprep.subr.bf16.mxu1 %v1190_v3  ;;  %1149 = vmatprep.subr.bf16.mxu0 %v1190_v3 }
  0x62   :  { %1079 = vmatpush3.bf16.msra.mxu1 %v1078_v23  ;;  %1151 = vmatpush3.bf16.msra.mxu0 %v1379_v63 }
  0x65   :  { %901 = vmatmul.mubr.f32.vlgmr.msra.gmra.mrb[0].mxu1 %v1319_v40  ;;  %1006 = vmatmul.mubr.f32.vlgmr.msra.gmra.mrb[0].mxu0 %v1291_v30 }
 0x138   :  { %v381_v32 = vpop.f32.mrb[0].mxu1  ;;  %v676_v37 = vpop.f32.mrb[0].mxu0 }
 0x139   :  { %v1152_v38 = vadd.f32 %v695_v31, %v381_v32  ;;  %v902_v41 = vpop.f32.mrb[1].mxu1  ;;  %v1007_v47 = vpop.f32.mrb[1].mxu0 }
 0x13b   :  { %v1153_v48 = vadd.f32 %v1152_v38, %v676_v37 }
 0x13d   :  { %680 = vst [vmem:[#allocation2] sm:$0xff] %v1153_v48 }
 0x13e   :  { %1177 = shalt.err (!%p1174_p4)
}
 0x13f   :  { %s1178_s2 = scalar_lea.hbm %s1530_s3, 128 }
 0x140   :  { %p1179_p5 = scmp.ne.s32.totalorder %s1530_s3, %s1178_s2  ;;  %p1182_p6 = scmp.lt.u32.totalorder %s1178_s2, %s1530_s3 }
 0x142   :  { %p1184_p7 = pnand %p1182_p6, %p1179_p5 }
 0x144   :  { %1187 = shalt.err (!%p1184_p7)
}
 0x145   :  { %690 = dma.vmem_to_hbm [thread:$0]  %s688_s20, 128, %s1530_s3, [#allocation3]  }
 0x146   :  { %1188 = dma.done.wait [#allocation3], 128  }
 0x147   :  { %1189 = vsyncadd [#allocation3], 4294967168 }
 0x148   :  { %694 = vsyncpa [#allocation3], 1 }

</bundles_post_ra>
